<compile_context>
chip_gen: v7x
topology: tpu7x:2x2x1
jax: 0.10.0
libtpu: 0.0.40
codegen_flags: <defaults>
</compile_context>

<pallas_src>
import jax
import jax.numpy as jnp
from jax.experimental import pallas as pl
from jax.experimental.pallas import tpu as pltpu


# ------------------------------------------------------------------ kernel --

def mlp_fused_kernel(x_ref, w1_ref, b1_ref, w2_ref, b2_ref, w3_ref, b3_ref,
                     w4_ref, b4_ref, o_ref):
    """Fused 4-layer MLP with tanh activations on one (Bt, D) batch tile.

    x_ref  : (Bt, D)      flattened input tile (f32 or bf16)
    wK_ref : (inK, outK)  pre-transposed weights (w1 may be bf16)
    bK_ref : (1, outK)    biases (f32)
    o_ref  : (Bt, O)      logits tile (f32)
    """
    h = jnp.tanh(
        jnp.dot(x_ref[...], w1_ref[...], preferred_element_type=jnp.float32)
        + b1_ref[...]
    )
    h = jnp.tanh(
        jnp.dot(h, w2_ref[...], preferred_element_type=jnp.float32)
        + b2_ref[...]
    )
    h = jnp.tanh(
        jnp.dot(h, w3_ref[...], preferred_element_type=jnp.float32)
        + b3_ref[...]
    )
    o_ref[...] = (
        jnp.dot(h, w4_ref[...], preferred_element_type=jnp.float32)
        + b4_ref[...]
    ).astype(o_ref.dtype)


# ----------------------------------------------------------------- wrapper --

def basic_lc6kmf3_forward(x, params, *, block_b=512, cast_bf16=False):
    """x: (B, ...) arbitrary trailing dims -> (B, output_dim) f32 logits."""
    B = x.shape[0]
    x2d = x.reshape(B, -1)                      # nn.Flatten (free, row-major)
    D = x2d.shape[1]
    (w1t, b1), (w2t, b2), (w3t, b3), (w4t, b4) = params
    O = w4t.shape[1]

    if cast_bf16:
        # Halve the dominant HBM traffic (x read + w1).  Accumulation in the
        # kernel stays f32 via preferred_element_type.
        x2d = x2d.astype(jnp.bfloat16)
        w1t = w1t.astype(jnp.bfloat16)

    # Batch tile: multiple of 8 (f32/bf16 sublane rule) when tiling is needed;
    # if the whole batch fits in one block, use the full (always-legal) extent.
    if B <= block_b:
        bt = B
    else:
        bt = (block_b // 8) * 8 or 8
    grid = (pl.cdiv(B, bt),)

    # Weights/biases: constant index_map -> fetched once, VMEM-resident.
    const2d = lambda shape: pl.BlockSpec(shape, lambda i: (0, 0))

    return pl.pallas_call(
        mlp_fused_kernel,
        out_shape=jax.ShapeDtypeStruct((B, O), jnp.float32),
        grid=grid,
        in_specs=[
            pl.BlockSpec((bt, D), lambda i: (i, 0)),      # x: streamed per tile
            const2d(w1t.shape), const2d(b1.shape),
            const2d(w2t.shape), const2d(b2.shape),
            const2d(w3t.shape), const2d(b3.shape),
            const2d(w4t.shape), const2d(b4.shape),
        ],
        out_specs=pl.BlockSpec((bt, O), lambda i: (i, 0)),
        compiler_params=pltpu.CompilerParams(
            # Batch tiles are independent -> shard across both TCs on v7x.
            dimension_semantics=("parallel",),
        ),
    )(x2d, w1t, b1, w2t, b2, w3t, b3, w4t, b4)


# ------------------------------------------------------------------ params --

def init_params(key, input_dim, output_dim):
    """PyTorch-shaped nn.Linear params, pre-transposed for the kernel.

    nn.Linear(in, out): W (out, in), b (out,), init U(-1/sqrt(in), 1/sqrt(in)).
    Stored as (W.T, b[None, :]) so every matmul is a plain row-major MXU dot.
    """
    dims = [(input_dim, 24), (24, 12), (12, 7), (7, output_dim)]
    layers = []
    for (d_in, d_out) in dims:
        key, kw, kb = jax.random.split(key, 3)
        bound = 1.0 / float(d_in) ** 0.5
        w = jax.random.uniform(kw, (d_out, d_in), jnp.float32, -bound, bound)
        b = jax.random.uniform(kb, (d_out,), jnp.float32, -bound, bound)
        layers.append((w.T, b.reshape(1, -1)))
    return layers


# --------------------------------------------------------------- reference --

def reference_forward(x, params):
    """Pure-JAX f32 reference of the same math (for correctness checks)."""
    h = x.reshape(x.shape[0], -1)
    (w1t, b1), (w2t, b2), (w3t, b3), (w4t, b4) = params
    h = jnp.tanh(h @ w1t + b1)
    h = jnp.tanh(h @ w2t + b2)
    h = jnp.tanh(h @ w3t + b3)
    return h @ w4t + b4


# -------------------------------------------------------------------- main --

if __name__ == "__main__":
    C, Hs, Ws = 4, 16, 16
    input_dim = C * Hs * Ws                    # flattened feature dim = 1024
    output_dim = 4

    key = jax.random.PRNGKey(0)
    key, kp = jax.random.split(key)
    params = init_params(kp, input_dim, output_dim)

    # 1) Small demo shape (B=2): single full-extent block, launch-bound case.
    key, kx = jax.random.split(key)
    x_small = jax.random.normal(kx, (2, C, Hs, Ws), jnp.float32)
    out_small = jax.block_until_ready(basic_lc6kmf3_forward(x_small, params))
    ref_small = reference_forward(x_small, params)
    assert out_small.shape == (2, output_dim)
    assert jnp.allclose(out_small, ref_small, atol=1e-5, rtol=1e-5), \
        "small-batch mismatch vs reference"

    # 2) Larger ragged batch: exercises the batch-tiled grid + tail masking.
    key, kx = jax.random.split(key)
    B_big = 1032                                 # cdiv(1032, 512) = 3 tiles
    x_big = jax.random.normal(kx, (B_big, C, Hs, Ws), jnp.float32)
    out_big = jax.block_until_ready(
        basic_lc6kmf3_forward(x_big, params, block_b=512))
    ref_big = reference_forward(x_big, params)
    assert out_big.shape == (B_big, output_dim)
    assert jnp.allclose(out_big, ref_big, atol=1e-5, rtol=1e-5), \
        "tiled-batch mismatch vs reference"

    # 3) bf16 x/w1 path (halves HBM traffic); compare with relaxed tolerance.
    out_bf16 = jax.block_until_ready(
        basic_lc6kmf3_forward(x_big, params, block_b=512, cast_bf16=True))
    assert jnp.allclose(out_bf16, ref_big, atol=3e-2, rtol=3e-2), \
        "bf16-path mismatch vs f32 reference"

    print("KERNEL_OK")
</pallas_src>

<mosaic_0001>
module attributes {stable_mosaic.version = 11 : i64} {
  func.func @mlp_fused_kernel(%arg0: i32, %arg1: memref<2x1024xf32, #tpu.memory_space<vmem>>, %arg2: memref<1024x24xf32, #tpu.memory_space<vmem>>, %arg3: memref<1x24xf32, #tpu.memory_space<vmem>>, %arg4: memref<24x12xf32, #tpu.memory_space<vmem>>, %arg5: memref<1x12xf32, #tpu.memory_space<vmem>>, %arg6: memref<12x7xf32, #tpu.memory_space<vmem>>, %arg7: memref<1x7xf32, #tpu.memory_space<vmem>>, %arg8: memref<7x4xf32, #tpu.memory_space<vmem>>, %arg9: memref<1x4xf32, #tpu.memory_space<vmem>>, %arg10: memref<2x4xf32, #tpu.memory_space<vmem>>) attributes {dimension_semantics = [#tpu.dimension_semantics<parallel>], iteration_bounds = array<i64: 1>, scalar_prefetch = 0 : i64, scratch_operands = 0 : i64, tpu.core_type = #tpu.core_type<tc>, window_params = [{transform_indices = @transform_0, window_bounds = array<i64: 2, 1024>}, {pipeline_mode = #tpu.pipeline_mode<synchronous>, transform_indices = @transform_1, window_bounds = array<i64: 1024, 24>}, {pipeline_mode = #tpu.pipeline_mode<synchronous>, transform_indices = @transform_2, window_bounds = array<i64: 1, 24>}, {pipeline_mode = #tpu.pipeline_mode<synchronous>, transform_indices = @transform_3, window_bounds = array<i64: 24, 12>}, {pipeline_mode = #tpu.pipeline_mode<synchronous>, transform_indices = @transform_4, window_bounds = array<i64: 1, 12>}, {pipeline_mode = #tpu.pipeline_mode<synchronous>, transform_indices = @transform_5, window_bounds = array<i64: 12, 7>}, {pipeline_mode = #tpu.pipeline_mode<synchronous>, transform_indices = @transform_6, window_bounds = array<i64: 1, 7>}, {pipeline_mode = #tpu.pipeline_mode<synchronous>, transform_indices = @transform_7, window_bounds = array<i64: 7, 4>}, {pipeline_mode = #tpu.pipeline_mode<synchronous>, transform_indices = @transform_8, window_bounds = array<i64: 1, 4>}, {transform_indices = @transform_9, window_bounds = array<i64: 2, 4>}]} {
    %c0 = arith.constant 0 : index
    %c0_0 = arith.constant 0 : index
    %0 = vector.load %arg1[%c0, %c0_0] : memref<2x1024xf32, #tpu.memory_space<vmem>>, vector<2x1024xf32>
    %c0_1 = arith.constant 0 : index
    %c0_2 = arith.constant 0 : index
    %1 = vector.load %arg2[%c0_1, %c0_2] : memref<1024x24xf32, #tpu.memory_space<vmem>>, vector<1024x24xf32>
    %cst = arith.constant dense<0.000000e+00> : vector<2x24xf32>
    %2 = tpu.matmul %0, %1, %cst {dimension_numbers = #tpu.dot_dimension_numbers<[1], [0], [0], [1], [0, 0, 1, 1], [], []>} : vector<2x1024xf32>, vector<1024x24xf32>, vector<2x24xf32> -> vector<2x24xf32>
    %c0_3 = arith.constant 0 : index
    %c0_4 = arith.constant 0 : index
    %3 = vector.load %arg3[%c0_3, %c0_4] : memref<1x24xf32, #tpu.memory_space<vmem>>, vector<1x24xf32>
    %4 = vector.broadcast %3 : vector<1x24xf32> to vector<2x24xf32>
    %5 = arith.addf %2, %4 : vector<2x24xf32>
    %6 = math.tanh %5 : vector<2x24xf32>
    %c0_5 = arith.constant 0 : index
    %c0_6 = arith.constant 0 : index
    %7 = vector.load %arg4[%c0_5, %c0_6] : memref<24x12xf32, #tpu.memory_space<vmem>>, vector<24x12xf32>
    %cst_7 = arith.constant dense<0.000000e+00> : vector<2x12xf32>
    %8 = tpu.matmul %6, %7, %cst_7 {dimension_numbers = #tpu.dot_dimension_numbers<[1], [0], [0], [1], [0, 0, 1, 1], [], []>} : vector<2x24xf32>, vector<24x12xf32>, vector<2x12xf32> -> vector<2x12xf32>
    %c0_8 = arith.constant 0 : index
    %c0_9 = arith.constant 0 : index
    %9 = vector.load %arg5[%c0_8, %c0_9] : memref<1x12xf32, #tpu.memory_space<vmem>>, vector<1x12xf32>
    %10 = vector.broadcast %9 : vector<1x12xf32> to vector<2x12xf32>
    %11 = arith.addf %8, %10 : vector<2x12xf32>
    %12 = math.tanh %11 : vector<2x12xf32>
    %c0_10 = arith.constant 0 : index
    %c0_11 = arith.constant 0 : index
    %13 = vector.load %arg6[%c0_10, %c0_11] : memref<12x7xf32, #tpu.memory_space<vmem>>, vector<12x7xf32>
    %cst_12 = arith.constant dense<0.000000e+00> : vector<2x7xf32>
    %14 = tpu.matmul %12, %13, %cst_12 {dimension_numbers = #tpu.dot_dimension_numbers<[1], [0], [0], [1], [0, 0, 1, 1], [], []>} : vector<2x12xf32>, vector<12x7xf32>, vector<2x7xf32> -> vector<2x7xf32>
    %c0_13 = arith.constant 0 : index
    %c0_14 = arith.constant 0 : index
    %15 = vector.load %arg7[%c0_13, %c0_14] : memref<1x7xf32, #tpu.memory_space<vmem>>, vector<1x7xf32>
    %16 = vector.broadcast %15 : vector<1x7xf32> to vector<2x7xf32>
    %17 = arith.addf %14, %16 : vector<2x7xf32>
    %18 = math.tanh %17 : vector<2x7xf32>
    %c0_15 = arith.constant 0 : index
    %c0_16 = arith.constant 0 : index
    %19 = vector.load %arg8[%c0_15, %c0_16] : memref<7x4xf32, #tpu.memory_space<vmem>>, vector<7x4xf32>
    %cst_17 = arith.constant dense<0.000000e+00> : vector<2x4xf32>
    %20 = tpu.matmul %18, %19, %cst_17 {dimension_numbers = #tpu.dot_dimension_numbers<[1], [0], [0], [1], [0, 0, 1, 1], [], []>} : vector<2x7xf32>, vector<7x4xf32>, vector<2x4xf32> -> vector<2x4xf32>
    %c0_18 = arith.constant 0 : index
    %c0_19 = arith.constant 0 : index
    %21 = vector.load %arg9[%c0_18, %c0_19] : memref<1x4xf32, #tpu.memory_space<vmem>>, vector<1x4xf32>
    %22 = vector.broadcast %21 : vector<1x4xf32> to vector<2x4xf32>
    %23 = arith.addf %20, %22 : vector<2x4xf32>
    %c0_20 = arith.constant 0 : index
    %c0_21 = arith.constant 0 : index
    %24 = vector.load %arg10[%c0_20, %c0_21] : memref<2x4xf32, #tpu.memory_space<vmem>>, vector<2x4xf32>
    tpu.vector_store %arg10[%c0_20, %c0_21], %23 {strides = array<i32>} : memref<2x4xf32, #tpu.memory_space<vmem>>, vector<2x4xf32>,
    return
  }
  func.func @transform_0(%arg0: i32) -> (i32, i32) {
    %c0_i32 = arith.constant 0 : i32
    %c0_i32_0 = arith.constant 0 : i32
    return %arg0, %c0_i32 : i32, i32
  }
  func.func @transform_1(%arg0: i32) -> (i32, i32) {
    %c0_i32 = arith.constant 0 : i32
    %c0_i32_0 = arith.constant 0 : i32
    %c0_i32_1 = arith.constant 0 : i32
    return %c0_i32, %c0_i32_0 : i32, i32
  }
  func.func @transform_2(%arg0: i32) -> (i32, i32) {
    %c0_i32 = arith.constant 0 : i32
    %c0_i32_0 = arith.constant 0 : i32
    %c0_i32_1 = arith.constant 0 : i32
    return %c0_i32, %c0_i32_0 : i32, i32
  }
  func.func @transform_3(%arg0: i32) -> (i32, i32) {
    %c0_i32 = arith.constant 0 : i32
    %c0_i32_0 = arith.constant 0 : i32
    %c0_i32_1 = arith.constant 0 : i32
    return %c0_i32, %c0_i32_0 : i32, i32
  }
  func.func @transform_4(%arg0: i32) -> (i32, i32) {
    %c0_i32 = arith.constant 0 : i32
    %c0_i32_0 = arith.constant 0 : i32
    %c0_i32_1 = arith.constant 0 : i32
    return %c0_i32, %c0_i32_0 : i32, i32
  }
  func.func @transform_5(%arg0: i32) -> (i32, i32) {
    %c0_i32 = arith.constant 0 : i32
    %c0_i32_0 = arith.constant 0 : i32
    %c0_i32_1 = arith.constant 0 : i32
    return %c0_i32, %c0_i32_0 : i32, i32
  }
  func.func @transform_6(%arg0: i32) -> (i32, i32) {
    %c0_i32 = arith.constant 0 : i32
    %c0_i32_0 = arith.constant 0 : i32
    %c0_i32_1 = arith.constant 0 : i32
    return %c0_i32, %c0_i32_0 : i32, i32
  }
  func.func @transform_7(%arg0: i32) -> (i32, i32) {
    %c0_i32 = arith.constant 0 : i32
    %c0_i32_0 = arith.constant 0 : i32
    %c0_i32_1 = arith.constant 0 : i32
    return %c0_i32, %c0_i32_0 : i32, i32
  }
  func.func @transform_8(%arg0: i32) -> (i32, i32) {
    %c0_i32 = arith.constant 0 : i32
    %c0_i32_0 = arith.constant 0 : i32
    %c0_i32_1 = arith.constant 0 : i32
    return %c0_i32, %c0_i32_0 : i32, i32
  }
  func.func @transform_9(%arg0: i32) -> (i32, i32) {
    %c0_i32 = arith.constant 0 : i32
    %c0_i32_0 = arith.constant 0 : i32
    return %arg0, %c0_i32 : i32, i32
  }
}

</mosaic_0001>

<bundles_post_ra>
// kernel: tpu_custom_call.1
= control target key start
LH: loop header
LB: loop body
LE: loop exit
PB: predicated region body
PF: predicated region fallthrough
CT: control target
= control target key end

     0   :  { %v1122_v47 = vmov 1983009808   ;;  %v176_v49 = vlaneseq  ;;  %s1624_s0 = inlined_call_operand.vmem [shape: f32[2,1024], index: 0, kind: input, shape index: {}]   ;;  %s1625_s1 = inlined_call_operand.vmem [shape: f32[1024,24], index: 1, kind: input, shape index: {}]   ;;  %s1626_s2 = inlined_call_operand.vmem [shape: f32[1,24], index: 2, kind: input, shape index: {}]   ;;  %s1627_s3 = inlined_call_operand.vmem [shape: f32[24,12], index: 3, kind: input, shape index: {}]   ;;  %s1628_s4 = inlined_call_operand.vmem [shape: f32[1,12], index: 4, kind: input, shape index: {}]   ;;  %s1629_s5 = inlined_call_operand.vmem [shape: f32[12,7], index: 5, kind: input, shape index: {}]   ;;  %s1630_s6 = inlined_call_operand.vmem [shape: f32[1,7], index: 6, kind: input, shape index: {}]   ;;  %s1631_s7 = inlined_call_operand.vmem [shape: f32[7,4], index: 7, kind: input, shape index: {}]   ;;  %s1632_s8 = inlined_call_operand.vmem [shape: f32[1,4], index: 8, kind: input, shape index: {}]   ;;  %s1633_s9 = inlined_call_operand.hbm [shape: f32[2,4], index: 9, kind: output, shape index: {}]  }
   0x1   :  { %v51_v0 = vld [vmem:[%s1625_s1 + $0x80] sm:$0xff]  ;;  %v52_v1 = vld [vmem:[%s1625_s1 + $0x88] sm:$0xff]  ;;  %v53_v11 = vld [vmem:[%s1625_s1 + $0x90] sm:$0xff]  ;;  %v174_v48 = vunpack.c.l.s4 %v1122_v47 }
   0x2   :  { %v35_v2 = vld [vmem:[%s1625_s1] sm:$0xff]  ;;  %v949_v3 = vpack.c.bf16 %v52_v1, %v51_v0  ;;  %v36_v4 = vld [vmem:[%s1625_s1 + $0x8] sm:$0xff]  ;;  %v54_v13 = vld [vmem:[%s1625_s1 + $0x98] sm:$0xff]  ;;  %v177_v0 = vshrl.u32 %v176_v49, 7 }
   0x3   :  { %v83_v5 = vld [vmem:[%s1625_s1 + $0x180] sm:$0xff]  ;;  %v84_v6 = vld [vmem:[%s1625_s1 + $0x188] sm:$0xff]  ;;  %v951_v7 = vpack.c.bf16 %v36_v4, %v35_v2  ;;  %v37_v14 = vld [vmem:[%s1625_s1 + $0x10] sm:$0xff]  ;;  %v953_v16 = vpack.c.bf16 %v54_v13, %v53_v11  ;;  %v175_v63 = vunpack.c.0.s8 %v174_v48 }
   0x4   :  { %v981_v8 = vpack.c.bf16 %v84_v6, %v83_v5  ;;  %v67_v9 = vld [vmem:[%s1625_s1 + $0x100] sm:$0xff]  ;;  %v68_v10 = vld [vmem:[%s1625_s1 + $0x108] sm:$0xff]  ;;  %950 = vmatprep.subr.bf16.mxu0 %v949_v3  ;;  %v38_v15 = vld [vmem:[%s1625_s1 + $0x18] sm:$0xff] }
   0x5   :  { %v983_v12 = vpack.c.bf16 %v68_v10, %v67_v9  ;;  %952 = vmatpush3.bf16.msra.mxu0 %v951_v7  ;;  %v955_v17 = vpack.c.bf16 %v38_v15, %v37_v14  ;;  %v85_v18 = vld [vmem:[%s1625_s1 + $0x190] sm:$0xff]  ;;  %v86_v19 = vld [vmem:[%s1625_s1 + $0x198] sm:$0xff]  ;;  %v55_v23 = vld [vmem:[%s1625_s1 + $0xa0] sm:$0xff]  ;;  %v1328_v13 = vsub.s32 %v175_v63, %v177_v0 }
   0x6   :  { %982 = vmatprep.subr.bf16.mxu1 %v981_v8  ;;  %v69_v20 = vld [vmem:[%s1625_s1 + $0x110] sm:$0xff]  ;;  %v985_v21 = vpack.c.bf16 %v86_v19, %v85_v18  ;;  %v70_v22 = vld [vmem:[%s1625_s1 + $0x118] sm:$0xff]  ;;  %v56_v24 = vld [vmem:[%s1625_s1 + $0xa8] sm:$0xff]  ;;  %954 = vmatprep.subr.bf16.mxu0 %v953_v16 }
   0x7   :  { %984 = vmatpush3.bf16.msra.mxu1 %v983_v12  ;;  %v987_v25 = vpack.c.bf16 %v70_v22, %v69_v20  ;;  %v957_v26 = vpack.c.bf16 %v56_v24, %v55_v23  ;;  %v39_v27 = vld [vmem:[%s1625_s1 + $0x20] sm:$0xff]  ;;  %v40_v28 = vld [vmem:[%s1625_s1 + $0x28] sm:$0xff]  ;;  %v57_v35 = vld [vmem:[%s1625_s1 + $0xb0] sm:$0xff] }
   0x8   :  { %v87_v29 = vld [vmem:[%s1625_s1 + $0x1a0] sm:$0xff]  ;;  %986 = vmatprep.subr.bf16.mxu1 %v985_v21  ;;  %v88_v30 = vld [vmem:[%s1625_s1 + $0x1a8] sm:$0xff]  ;;  %v959_v33 = vpack.c.bf16 %v40_v28, %v39_v27  ;;  %v58_v36 = vld [vmem:[%s1625_s1 + $0xb8] sm:$0xff] }
   0x9   :  { %v71_v31 = vld [vmem:[%s1625_s1 + $0x120] sm:$0xff]  ;;  %v72_v32 = vld [vmem:[%s1625_s1 + $0x128] sm:$0xff]  ;;  %956 = vmatpush3.bf16.msra.mxu0 %v955_v17  ;;  %v989_v34 = vpack.c.bf16 %v88_v30, %v87_v29  ;;  %v41_v37 = vld [vmem:[%s1625_s1 + $0x30] sm:$0xff]  ;;  %v961_v39 = vpack.c.bf16 %v58_v36, %v57_v35 }
   0xa   :  { %958 = vmatprep.subr.bf16.mxu0 %v957_v26  ;;  %v991_v38 = vpack.c.bf16 %v72_v32, %v71_v31  ;;  %v42_v40 = vld [vmem:[%s1625_s1 + $0x38] sm:$0xff]  ;;  %v89_v41 = vld [vmem:[%s1625_s1 + $0x1b0] sm:$0xff]  ;;  %v59_v46 = vld [vmem:[%s1625_s1 + $0xc0] sm:$0xff] }
   0xb   :  { %988 = vmatpush3.bf16.msra.mxu1 %v987_v25  ;;  %v90_v42 = vld [vmem:[%s1625_s1 + $0x1b8] sm:$0xff]  ;;  %v73_v44 = vld [vmem:[%s1625_s1 + $0x130] sm:$0xff]  ;;  %v60_v50 = vld [vmem:[%s1625_s1 + $0xc8] sm:$0xff]  ;;  %v963_v51 = vpack.c.bf16 %v42_v40, %v41_v37 }
   0xc   :  { %990 = vmatprep.subr.bf16.mxu1 %v989_v34  ;;  %v993_v43 = vpack.c.bf16 %v90_v42, %v89_v41  ;;  %v74_v45 = vld [vmem:[%s1625_s1 + $0x138] sm:$0xff]  ;;  %v91_v52 = vld [vmem:[%s1625_s1 + $0x1c0] sm:$0xff]  ;;  %v92_v53 = vld [vmem:[%s1625_s1 + $0x1c8] sm:$0xff]  ;;  %v965_v55 = vpack.c.bf16 %v60_v50, %v59_v46 }
   0xd   :  { %960 = vmatpush3.bf16.msra.mxu0 %v959_v33  ;;  %v995_v54 = vpack.c.bf16 %v74_v45, %v73_v44  ;;  %v43_v56 = vld [vmem:[%s1625_s1 + $0x40] sm:$0xff]  ;;  %v44_v57 = vld [vmem:[%s1625_s1 + $0x48] sm:$0xff]  ;;  %v997_v59 = vpack.c.bf16 %v92_v53, %v91_v52  ;;  %v61_v61 = vld [vmem:[%s1625_s1 + $0xd0] sm:$0xff] }
   0xe   :  { %962 = vmatprep.subr.bf16.mxu0 %v961_v39  ;;  %v75_v58 = vld [vmem:[%s1625_s1 + $0x140] sm:$0xff]  ;;  %v76_v60 = vld [vmem:[%s1625_s1 + $0x148] sm:$0xff]  ;;  %v62_v62 = vld [vmem:[%s1625_s1 + $0xd8] sm:$0xff]  ;;  %v967_v3 = vpack.c.bf16 %v44_v57, %v43_v56 }
   0xf   :  { %992 = vmatpush3.bf16.msra.mxu1 %v991_v38  ;;  %v93_v1 = vld [vmem:[%s1625_s1 + $0x1d0] sm:$0xff]  ;;  %v94_v2 = vld [vmem:[%s1625_s1 + $0x1d8] sm:$0xff]  ;;  %v999_v4 = vpack.c.bf16 %v76_v60, %v75_v58  ;;  %v969_v5 = vpack.c.bf16 %v62_v62, %v61_v61  ;;  %v63_v11 = vld [vmem:[%s1625_s1 + $0xe0] sm:$0xff] }
  0x10   :  { %994 = vmatprep.subr.bf16.mxu1 %v993_v43  ;;  %v45_v6 = vld [vmem:[%s1625_s1 + $0x50] sm:$0xff]  ;;  %v46_v7 = vld [vmem:[%s1625_s1 + $0x58] sm:$0xff]  ;;  %v1001_v9 = vpack.c.bf16 %v94_v2, %v93_v1  ;;  %v64_v12 = vld [vmem:[%s1625_s1 + $0xe8] sm:$0xff] }
  0x11   :  { %964 = vmatpush3.bf16.msra.mxu0 %v963_v51  ;;  %v77_v8 = vld [vmem:[%s1625_s1 + $0x150] sm:$0xff]  ;;  %v78_v10 = vld [vmem:[%s1625_s1 + $0x158] sm:$0xff]  ;;  %v95_v14 = vld [vmem:[%s1625_s1 + $0x1e0] sm:$0xff]  ;;  %v971_v16 = vpack.c.bf16 %v46_v7, %v45_v6  ;;  %v973_v19 = vpack.c.bf16 %v64_v12, %v63_v11 }
  0x12   :  { %966 = vmatprep.subr.bf16.mxu0 %v965_v55  ;;  %v96_v15 = vld [vmem:[%s1625_s1 + $0x1e8] sm:$0xff]  ;;  %v47_v17 = vld [vmem:[%s1625_s1 + $0x60] sm:$0xff]  ;;  %v1003_v18 = vpack.c.bf16 %v78_v10, %v77_v8  ;;  %v65_v25 = vld [vmem:[%s1625_s1 + $0xf0] sm:$0xff] }
  0x13   :  { %996 = vmatpush3.bf16.msra.mxu1 %v995_v54  ;;  %v48_v20 = vld [vmem:[%s1625_s1 + $0x68] sm:$0xff]  ;;  %v79_v21 = vld [vmem:[%s1625_s1 + $0x160] sm:$0xff]  ;;  %v1005_v23 = vpack.c.bf16 %v96_v15, %v95_v14  ;;  %v66_v26 = vld [vmem:[%s1625_s1 + $0xf8] sm:$0xff] }
  0x14   :  { %998 = vmatprep.subr.bf16.mxu1 %v997_v59  ;;  %v33_v22 = vld [vmem:[%s1624_s0] sm:$0xff]  ;;  %v80_v24 = vld [vmem:[%s1625_s1 + $0x168] sm:$0xff]  ;;  %v97_v29 = vld [vmem:[%s1625_s1 + $0x1f0] sm:$0xff]  ;;  %v975_v31 = vpack.c.bf16 %v48_v20, %v47_v17  ;;  %v977_v35 = vpack.c.bf16 %v66_v26, %v65_v25 }
  0x15   :  { %968 = vmatpush3.bf16.msra.mxu0 %v967_v3  ;;  %v179_v27 = vrot.slane %v33_v22, %v1328_v13  ;;  %v172_v28 = vcombine.high %v33_v22, %v33_v22  ;;  %v98_v30 = vld [vmem:[%s1625_s1 + $0x1f8] sm:$0xff]  ;;  %v1007_v34 = vpack.c.bf16 %v80_v24, %v79_v21  ;;  %v49_v36 = vld [vmem:[%s1625_s1 + $0x70] sm:$0xff]  ;;  %v115_v41 = vld [vmem:[%s1625_s1 + $0x280] sm:$0xff] }
  0x16   :  { %970 = vmatprep.subr.bf16.mxu0 %v969_v5  ;;  %v50_v37 = vld [vmem:[%s1625_s1 + $0x78] sm:$0xff]  ;;  %v81_v38 = vld [vmem:[%s1625_s1 + $0x170] sm:$0xff]  ;;  %v1009_v39 = vpack.c.bf16 %v98_v30, %v97_v29  ;;  %v116_v42 = vld [vmem:[%s1625_s1 + $0x288] sm:$0xff] }
  0x17   :  { %1000 = vmatpush3.bf16.msra.mxu1 %v999_v4  ;;  %v187_v32 = vcombine.high %v179_v27, %v179_v27  ;;  %v186_v33 = vrot.slane %v172_v28, %v1328_v13  ;;  %v82_v40 = vld [vmem:[%s1625_s1 + $0x178] sm:$0xff]  ;;  %v147_v44 = vld [vmem:[%s1625_s1 + $0x380] sm:$0xff]  ;;  %v148_v45 = vld [vmem:[%s1625_s1 + $0x388] sm:$0xff]  ;;  %v979_v46 = vpack.c.bf16 %v50_v37, %v49_v36  ;;  %v1013_v48 = vpack.c.bf16 %v116_v42, %v115_v41 }
  0x18   :  { %1002 = vmatprep.subr.bf16.mxu1 %v1001_v9  ;;  %v1011_v47 = vpack.c.bf16 %v82_v40, %v81_v38  ;;  %v99_v49 = vld [vmem:[%s1625_s1 + $0x200] sm:$0xff]  ;;  %v100_v50 = vld [vmem:[%s1625_s1 + $0x208] sm:$0xff]  ;;  %v1045_v52 = vpack.c.bf16 %v148_v45, %v147_v44  ;;  %v117_v54 = vld [vmem:[%s1625_s1 + $0x290] sm:$0xff] }
  0x19   :  { %972 = vmatpush3.bf16.msra.mxu0 %v971_v16  ;;  %278 = vmatprep.mubr.f32.mxu0 %v187_v32  ;;  %v188_v43 = vcombine.high %v186_v33, %v186_v33  ;;  %v131_v51 = vld [vmem:[%s1625_s1 + $0x300] sm:$0xff]  ;;  %v132_v53 = vld [vmem:[%s1625_s1 + $0x308] sm:$0xff]  ;;  %v118_v55 = vld [vmem:[%s1625_s1 + $0x298] sm:$0xff]  ;;  %v1015_v58 = vpack.c.bf16 %v100_v50, %v99_v49 }
  0x1a   :  { %974 = vmatprep.subr.bf16.mxu0 %v973_v19  ;;  %v149_v56 = vld [vmem:[%s1625_s1 + $0x390] sm:$0xff]  ;;  %v150_v57 = vld [vmem:[%s1625_s1 + $0x398] sm:$0xff]  ;;  %v1047_v59 = vpack.c.bf16 %v132_v53, %v131_v51  ;;  %v1017_v60 = vpack.c.bf16 %v118_v55, %v117_v54  ;;  %v119_v2 = vld [vmem:[%s1625_s1 + $0x2a0] sm:$0xff] }
  0x1b   :  { %1004 = vmatpush3.bf16.msra.mxu1 %v1003_v18  ;;  %348 = vmatprep.mubr.f32.mxu1 %v188_v43  ;;  %v101_v61 = vld [vmem:[%s1625_s1 + $0x210] sm:$0xff]  ;;  %v102_v62 = vld [vmem:[%s1625_s1 + $0x218] sm:$0xff]  ;;  %v1049_v0 = vpack.c.bf16 %v150_v57, %v149_v56  ;;  %v120_v3 = vld [vmem:[%s1625_s1 + $0x2a8] sm:$0xff] }
  0x1c   :  { %1006 = vmatprep.subr.bf16.mxu1 %v1005_v23  ;;  %v133_v63 = vld [vmem:[%s1625_s1 + $0x310] sm:$0xff]  ;;  %v134_v1 = vld [vmem:[%s1625_s1 + $0x318] sm:$0xff]  ;;  %v151_v4 = vld [vmem:[%s1625_s1 + $0x3a0] sm:$0xff]  ;;  %v1019_v6 = vpack.c.bf16 %v102_v62, %v101_v61  ;;  %v1021_v8 = vpack.c.bf16 %v120_v3, %v119_v2 }
  0x1d   :  { %976 = vmatpush3.bf16.msra.mxu0 %v975_v31  ;;  %v152_v5 = vld [vmem:[%s1625_s1 + $0x3a8] sm:$0xff]  ;;  %v1051_v7 = vpack.c.bf16 %v134_v1, %v133_v63  ;;  %v103_v9 = vld [vmem:[%s1625_s1 + $0x220] sm:$0xff]  ;;  %v121_v15 = vld [vmem:[%s1625_s1 + $0x2b0] sm:$0xff] }
  0x1e   :  { %978 = vmatprep.subr.bf16.mxu0 %v977_v35  ;;  %v104_v10 = vld [vmem:[%s1625_s1 + $0x228] sm:$0xff]  ;;  %v135_v11 = vld [vmem:[%s1625_s1 + $0x320] sm:$0xff]  ;;  %v1053_v12 = vpack.c.bf16 %v152_v5, %v151_v4  ;;  %v122_v16 = vld [vmem:[%s1625_s1 + $0x2b8] sm:$0xff] }
  0x1f   :  { %1008 = vmatpush3.bf16.msra.mxu1 %v1007_v34  ;;  %v136_v14 = vld [vmem:[%s1625_s1 + $0x328] sm:$0xff]  ;;  %v153_v17 = vld [vmem:[%s1625_s1 + $0x3b0] sm:$0xff]  ;;  %v154_v18 = vld [vmem:[%s1625_s1 + $0x3b8] sm:$0xff]  ;;  %v1023_v19 = vpack.c.bf16 %v104_v10, %v103_v9  ;;  %v1025_v22 = vpack.c.bf16 %v122_v16, %v121_v15 }
  0x20   :  { %1010 = vmatprep.subr.bf16.mxu1 %v1009_v39  ;;  %v105_v20 = vld [vmem:[%s1625_s1 + $0x230] sm:$0xff]  ;;  %v1055_v21 = vpack.c.bf16 %v136_v14, %v135_v11  ;;  %v106_v23 = vld [vmem:[%s1625_s1 + $0x238] sm:$0xff]  ;;  %v1057_v26 = vpack.c.bf16 %v154_v18, %v153_v17  ;;  %v124_v28 = vld [vmem:[%s1625_s1 + $0x2c8] sm:$0xff] }
  0x21   :  { %980 = vmatpush3.bf16.msra.mxu0 %v979_v46  ;;  %v137_v24 = vld [vmem:[%s1625_s1 + $0x330] sm:$0xff]  ;;  %v138_v25 = vld [vmem:[%s1625_s1 + $0x338] sm:$0xff]  ;;  %v155_v29 = vld [vmem:[%s1625_s1 + $0x3c0] sm:$0xff] }
  0x22   :  { %1014 = vmatprep.subr.bf16.mxu0 %v1013_v48  ;;  %v156_v30 = vld [vmem:[%s1625_s1 + $0x3c8] sm:$0xff] }
  0x23   :  { %1012 = vmatpush3.bf16.msra.mxu1 %v1011_v47  ;;  %v34_v31 = vld [vmem:[%s1624_s0 + $0x8] sm:$0xff] }
  0x24   :  { %1046 = vmatprep.subr.bf16.mxu1 %v1045_v52  ;;  %279 = vmatmul.mubr.f32.vlgmr.msra.gmra.mrb[0].mxu0 %v179_v27  ;;  %v123_v27 = vld [vmem:[%s1625_s1 + $0x2c0] sm:$0xff] }
  0x25   :  { %1016 = vmatpush3.bf16.msra.mxu0 %v1015_v58 }
  0x26   :  { %349 = vmatmul.mubr.f32.vlgmr.msra.gmra.mrb[0].mxu1 %v186_v33  ;;  %1018 = vmatprep.subr.bf16.mxu0 %v1017_v60 }
  0x27   :  { %1048 = vmatpush3.bf16.msra.mxu1 %v1047_v59 }
  0x28   :  { %1050 = vmatprep.subr.bf16.mxu1 %v1049_v0 }
  0x29   :  { %1020 = vmatpush3.bf16.msra.mxu0 %v1019_v6 }
  0x2a   :  { %1022 = vmatprep.subr.bf16.mxu0 %v1021_v8 }
  0x2b   :  { %1052 = vmatpush3.bf16.msra.mxu1 %v1051_v7 }
  0x2c   :  { %1054 = vmatprep.subr.bf16.mxu1 %v1053_v12 }
  0x2d   :  { %14 = vsyncpa [#allocation3], 0  ;;  %1024 = vmatpush3.bf16.msra.mxu0 %v1023_v19  ;;  %v1027_v32 = vpack.c.bf16 %v106_v23, %v105_v20  ;;  %v1489_v33 = vrot.slane %v34_v31, %v1328_v13  ;;  %v189_v34 = vcombine.high %v34_v31, %v34_v31  ;;  %v1059_v35 = vpack.c.bf16 %v138_v25, %v137_v24  ;;  %v107_v37 = vld [vmem:[%s1625_s1 + $0x240] sm:$0xff]  ;;  %v108_v38 = vld [vmem:[%s1625_s1 + $0x248] sm:$0xff]  ;;  %s1127_s28 = smov [#allocation2]  }
  0x2e   :  { %1026 = vmatprep.subr.bf16.mxu0 %v1025_v22  ;;  %v1029_v36 = vpack.c.bf16 %v124_v28, %v123_v27  ;;  %v139_v39 = vld [vmem:[%s1625_s1 + $0x340] sm:$0xff]  ;;  %v1061_v40 = vpack.c.bf16 %v156_v30, %v155_v29  ;;  %v140_v41 = vld [vmem:[%s1625_s1 + $0x348] sm:$0xff]  ;;  %v125_v42 = vld [vmem:[%s1625_s1 + $0x2d0] sm:$0xff]  ;;  %v1031_v48 = vpack.c.bf16 %v108_v38, %v107_v37  ;;  %vm1124_vm0 = vmmov 0   ;;  %s762_s29 = sshll.u32 %s1127_s28, 4  ;;  %s763_s29 = int_to_ptr.vmem [resolvable:$true] %s762_s29 }
  0x2f   :  { %1056 = vmatpush3.bf16.msra.mxu1 %v1055_v21  ;;  %v126_v43 = vld [vmem:[%s1625_s1 + $0x2d8] sm:$0xff]  ;;  %v204_v44 = vcombine.high %v1489_v33, %v1489_v33  ;;  %v203_v45 = vrot.slane %v189_v34, %v1328_v13  ;;  %v157_v46 = vld [vmem:[%s1625_s1 + $0x3d0] sm:$0xff]  ;;  %v1063_v50 = vpack.c.bf16 %v140_v41, %v139_v39  ;;  %v127_v56 = vld [vmem:[%s1625_s1 + $0x2e0] sm:$0xff]  ;;  %v1123_v21 = vmov 0.0|0.0   ;;  %p1103_p1 = scmp.lt.s32.totalorder %s763_s29, %s763_s29 }
  0x30   :  { %1058 = vmatprep.subr.bf16.mxu1 %v1057_v26  ;;  %v158_v47 = vld [vmem:[%s1625_s1 + $0x3d8] sm:$0xff]  ;;  %v1033_v51 = vpack.c.bf16 %v126_v43, %v125_v42  ;;  %v109_v13 = vld [vmem:[%s1625_s1 + $0x250] sm:$0xff]  ;;  %v128_v57 = vld [vmem:[%s1625_s1 + $0x2e8] sm:$0xff]  ;;  %v1125_v23 = vmov 0.0   ;;  %vm505_vm1 = vcmask 195584   ;;  %vm593_vm2 = vcmask 1043456  }
  0x31   :  { %1028 = vmatpush3.bf16.msra.mxu0 %v1027_v32  ;;  %418 = vmatprep.mubr.f32.mxu0 %v204_v44  ;;  %v205_v49 = vcombine.high %v203_v45, %v203_v45  ;;  %v110_v52 = vld [vmem:[%s1625_s1 + $0x258] sm:$0xff]  ;;  %v141_v53 = vld [vmem:[%s1625_s1 + $0x350] sm:$0xff]  ;;  %v1065_v54 = vpack.c.bf16 %v158_v47, %v157_v46  ;;  %v159_v58 = vld [vmem:[%s1625_s1 + $0x3e0] sm:$0xff]  ;;  %v1037_v62 = vpack.c.bf16 %v128_v57, %v127_v56  ;;  %vm1126_vm3 = vmmov 1  }
  0x32   :  { %1030 = vmatprep.subr.bf16.mxu0 %v1029_v36  ;;  %v142_v55 = vld [vmem:[%s1625_s1 + $0x358] sm:$0xff]  ;;  %v160_v59 = vld [vmem:[%s1625_s1 + $0x3e8] sm:$0xff]  ;;  %v1035_v60 = vpack.c.bf16 %v110_v52, %v109_v13  ;;  %v111_v63 = vld [vmem:[%s1625_s1 + $0x260] sm:$0xff]  ;;  %vm589_vm5 = vcmask 97280   ;;  %vm680_vm6 = vcmask 1046528   ;;  %vm676_vm7 = vcmask 56320  }
  0x33   :  { %1060 = vmatpush3.bf16.msra.mxu1 %v1059_v35  ;;  %488 = vmatprep.mubr.f32.mxu1 %v205_v49  ;;  %v1067_v61 = vpack.c.bf16 %v142_v55, %v141_v53  ;;  %v112_v0 = vld [vmem:[%s1625_s1 + $0x268] sm:$0xff]  ;;  %v143_v1 = vld [vmem:[%s1625_s1 + $0x360] sm:$0xff]  ;;  %v1069_v2 = vpack.c.bf16 %v160_v59, %v159_v58  ;;  %v129_v4 = vld [vmem:[%s1625_s1 + $0x2f0] sm:$0xff]  ;;  %vm754_vm8 = vcmask 25600  }
  0x34   :  { %1062 = vmatprep.subr.bf16.mxu1 %v1061_v40  ;;  %v144_v3 = vld [vmem:[%s1625_s1 + $0x368] sm:$0xff]  ;;  %v130_v5 = vld [vmem:[%s1625_s1 + $0x2f8] sm:$0xff]  ;;  %v161_v6 = vld [vmem:[%s1625_s1 + $0x3f0] sm:$0xff]  ;;  %v1039_v8 = vpack.c.bf16 %v112_v0, %v111_v63 }
  0x35   :  { %1032 = vmatpush3.bf16.msra.mxu0 %v1031_v48  ;;  %v162_v7 = vld [vmem:[%s1625_s1 + $0x3f8] sm:$0xff]  ;;  %v1071_v9 = vpack.c.bf16 %v144_v3, %v143_v1  ;;  %v1041_v10 = vpack.c.bf16 %v130_v5, %v129_v4  ;;  %v113_v11 = vld [vmem:[%s1625_s1 + $0x270] sm:$0xff]  ;;  %v495_v19 = vld [vmem:[%s1627_s3] sm:$0xff] }
  0x36   :  { %1034 = vmatprep.subr.bf16.mxu0 %v1033_v51  ;;  %v114_v12 = vld [vmem:[%s1625_s1 + $0x278] sm:$0xff]  ;;  %v1073_v14 = vpack.c.bf16 %v162_v7, %v161_v6  ;;  %v145_v15 = vld [vmem:[%s1625_s1 + $0x370] sm:$0xff]  ;;  %v496_v20 = vld [vmem:[%s1627_s3 + $0x8] sm:$0xff] }
  0x37   :  { %1064 = vmatpush3.bf16.msra.mxu1 %v1063_v50  ;;  %v146_v16 = vld [vmem:[%s1625_s1 + $0x378] sm:$0xff]  ;;  %v1043_v17 = vpack.c.bf16 %v114_v12, %v113_v11  ;;  %v1078_v22 = vpack.c.bf16 %v496_v20, %v495_v19  ;;  %v497_v24 = vld [vmem:[%s1627_s3 + $0x10] sm:$0xff]  ;;  %v770_v26 = vld [vmem:[%s1626_s2] ss:$0 sm:$0xff] }
  0x38   :  { %1066 = vmatprep.subr.bf16.mxu1 %v1065_v54  ;;  %v1075_v18 = vpack.c.bf16 %v146_v16, %v145_v15  ;;  %v580_v43 = vld [vmem:[%s1629_s5] sm:$0xff]  ;;  %v581_v44 = vld [vmem:[%s1629_s5 + $0x8] sm:$0xf]  ;;  %vm1082_vm4 = vmpackc.low %vm593_vm2, %vm1126_vm3 }
  0x39   :  { %1036 = vmatpush3.bf16.msra.mxu0 %v1035_v60  ;;  %v771_v46 = vld [vmem:[%s1628_s4] ss:$0 sm:$0xff] }
  0x3a   :  { %1038 = vmatprep.subr.bf16.mxu0 %v1037_v62  ;;  %v668_v51 = vld [vmem:[%s1631_s7] sm:$0x7f] }
  0x3b   :  { %1068 = vmatpush3.bf16.msra.mxu1 %v1067_v61  ;;  %v773_v13 = vld [vmem:[%s1630_s6] ss:$0 sm:$0xff]  ;;  %s1098_s6 = scalar_lea.vmem %s763_s29, 32 }
  0x3c   :  { %1070 = vmatprep.subr.bf16.mxu1 %v1069_v2  ;;  %v776_v56 = vld [vmem:[%s1632_s8] ss:$0 sm:$0xff]  ;;  %p1099_p0 = scmp.ne.s32.totalorder %s763_s29, %s1098_s6  ;;  %p1104_p2 = scmp.lt.s32.totalorder %s1098_s6, %s1098_s6 }
  0x3d   :  { %1040 = vmatpush3.bf16.msra.mxu0 %v1039_v8 }
  0x3e   :  { %1042 = vmatprep.subr.bf16.mxu0 %v1041_v10  ;;  %p1105_p3 = por %p1104_p2, %p1103_p1 }
  0x3f   :  { %1072 = vmatpush3.bf16.msra.mxu1 %v1071_v9 }
  0x40   :  { %1074 = vmatprep.subr.bf16.mxu1 %v1073_v14  ;;  %p1106_p4 = pnand %p1105_p3, %p1099_p0 }
  0x41   :  { %1044 = vmatpush3.bf16.msra.mxu0 %v1043_v17 }
  0x42   :  { %1077 = vmatprep.subr.bf16.mxu0 %v1123_v21 }
  0x43   :  { %1076 = vmatpush3.bf16.msra.mxu1 %v1075_v18 }
  0x44   :  { %419 = vmatmul.mubr.f32.vlgmr.msra.gmra.mrb[2].mxu0 %v1489_v33  ;;  %1080 = vmatprep.subr.bf16.mxu1 %v1123_v21 }
  0x45   :  { %934 = vmatprep.mubr.msk.f32.mxu0 %vm1124_vm0, %v1125_v23  ;;  %1079 = vmatpush3.bf16.msra.mxu0 %v1078_v22 }
  0x46   :  { %489 = vmatmul.mubr.f32.vlgmr.msra.gmra.mrb[2].mxu1 %v203_v45  ;;  %932 = vmatprep.subr.mxu0 %v1125_v23  ;;  %v1081_v45 = vpack.c.bf16 %v581_v44, %v580_v43 }
  0x47   :  { %941 = vmatprep.mubr.msk.f32.mxu1 %vm1124_vm0, %v1125_v23 }
  0x48   :  { %1083 = vmatpush3.bf16.msk.msra.mxu1 %vm1082_vm4, %v1081_v45 }
  0x49   :  { %933 = vmatpush3.msra.mxu0 %v497_v24  ;;  %944 = vmatprep.subr.mxu1 %v1125_v23 }
  0xf7   :  { %v811_v25 = vpop.f32.mrb[0].mxu0 }
  0xf8   :  { %v812_v27 = vpop.f32.mrb[1].mxu0 }
  0xf9   :  { %v846_v28 = vpop.f32.mrb[0].mxu1  ;;  %v813_v29 = vadd.f32 %v812_v27, %v811_v25 }
  0xfa   :  { %v847_v30 = vpop.f32.mrb[1].mxu1 }
  0xfb   :  { %v848_v31 = vadd.f32 %v847_v30, %v846_v28  ;;  %v281_v32 = vadd.f32 %v813_v29, %v770_v26 }
  0xfd   :  { %v351_v33 = vadd.f32 %v848_v31, %v281_v32 }
 0x117   :  { %v881_v34 = vpop.f32.mrb[2].mxu0 }
 0x118   :  { %v882_v35 = vpop.f32.mrb[3].mxu0 }
 0x119   :  { %v916_v36 = vpop.f32.mrb[2].mxu1  ;;  %v883_v37 = vadd.f32 %v882_v35, %v881_v34 }
 0x11a   :  { %v917_v38 = vpop.f32.mrb[3].mxu1 }
 0x11b   :  { %v918_v39 = vadd.f32 %v917_v38, %v916_v36  ;;  %v421_v40 = vadd.f32 %v883_v37, %v351_v33 }
 0x11d   :  { %v491_v41 = vadd.f32 %v918_v39, %v421_v40 }
 0x11f   :  { %1092 = vtanh.f32 %v491_v41 }
 0x129   :  { %v1093_v42 = vpop.eup %1092 }
 0x12a   :  { %935 = vmatmul.mubr.msk.f32.vlgmr.msra.gmra.mrb[4].mxu0 %vm505_vm1, %v1093_v42 }
 0x1fd   :  { %v575_v47 = vpop.f32.mrb[4].mxu0 }
 0x1fe   :  { %v576_v48 = vadd.f32 %v771_v46, %v575_v47  ;;  %v936_v49 = vpop.f32.mrb[5].mxu0 }
 0x200   :  { %1094 = vtanh.f32 %v576_v48 }
 0x20a   :  { %v1095_v50 = vpop.eup %1094 }
 0x20b   :  { %942 = vmatmul.mubr.msk.f32.vlgmr.msra.gmra.mrb[4].mxu1 %vm589_vm5, %v1095_v50 }
 0x20c   :  { %946 = vmatprep.mubr.msk.f32.mxu1 %vm1124_vm0, %v1125_v23  ;;  %945 = vmatpush3.msk.msra.mxu1 %vm680_vm6, %v668_v51 }
 0x2de   :  { %v663_v52 = vpop.f32.mrb[4].mxu1 }
 0x2df   :  { %v664_v53 = vadd.f32 %v773_v13, %v663_v52  ;;  %v943_v54 = vpop.f32.mrb[5].mxu1 }
 0x2e1   :  { %1096 = vtanh.f32 %v664_v53 }
 0x2eb   :  { %v1097_v55 = vpop.eup %1096 }
 0x2ec   :  { %947 = vmatmul.mubr.msk.f32.vlgmr.msra.gmra.mrb[6].mxu1 %vm676_vm7, %v1097_v55 }
 0x3bf   :  { %v750_v57 = vpop.f32.mrb[6].mxu1 }
 0x3c0   :  { %v751_v58 = vadd.f32 %v776_v56, %v750_v57  ;;  %v948_v59 = vpop.f32.mrb[7].mxu1 }
 0x3c2   :  { %755 = vst.msk [vmem:[#allocation2] sm:$0x3] %vm754_vm8, %v751_v58 }
 0x3c3   :  { %1109 = shalt.err (!%p1106_p4)
}
 0x3c4   :  { %s1110_s10 = scalar_lea.hbm %s1633_s9, 32 }
 0x3c5   :  { %p1111_p5 = scmp.ne.s32.totalorder %s1633_s9, %s1110_s10  ;;  %p1114_p6 = scmp.lt.u32.totalorder %s1110_s10, %s1633_s9 }
 0x3c7   :  { %p1116_p7 = pnand %p1114_p6, %p1111_p5 }
 0x3c9   :  { %1119 = shalt.err (!%p1116_p7)
}
 0x3ca   :  { %765 = dma.vmem_to_hbm [thread:$0]  %s763_s29, 32, %s1633_s9, [#allocation3]  }
 0x3cb   :  { %1120 = dma.done.wait [#allocation3], 32  }
 0x3cc   :  { %1121 = vsyncadd [#allocation3], 4294967264 }
 0x3cd   :  { %769 = vsyncpa [#allocation3], 1 }

</bundles_post_ra>
